<compile_context>
chip_gen: v5e
topology: v5e:2x2
jax: 0.10.0
libtpu: 0.0.40
codegen_flags: <defaults>
</compile_context>

<pallas_src>
import functools

import jax
import jax.numpy as jnp
import numpy as np
from jax.experimental import pallas as pl
from jax.experimental.pallas import tpu as pltpu


def temporal_block_kernel(x_ref, w1_ref, b1_ref, w2_ref, b2_ref,
                          wd_ref, bd_ref, o_ref, h1_scr,
                          *, dilation, has_downsample):
    """One grid step processes TB batch elements.

    x_ref : (TB, C_in, L + pad)   bf16, left-zero-padded input (pad=(K-1)*dilation)
    w1_ref: (K, C_out, C_in)      bf16 conv1 weight (tap-major)
    b1_ref: (C_out, 1)            f32
    w2_ref: (K, C_out, C_out)     bf16 conv2 weight (tap-major)
    b2_ref: (C_out, 1)            f32
    wd_ref: (C_out, C_in)         bf16 1x1 downsample weight (unused if no downsample)
    bd_ref: (C_out, 1)            f32
    o_ref : (TB, C_out, L)        f32
    h1_scr: (C_out, L + pad)      bf16 VMEM scratch (causally re-padded h1)
    """
    TB = o_ref.shape[0]
    L = o_ref.shape[-1]
    Lp = x_ref.shape[-1]
    pad = Lp - L
    K = w1_ref.shape[0]
    c_out = w1_ref.shape[1]
    d = dilation

    # Zero only the causal-pad columns of the scratch (cheap; [pad:] is always
    # fully overwritten below, so this stays valid for every batch element).
    if pad > 0:
        h1_scr[:, pl.ds(0, pad)] = jnp.zeros((c_out, pad), jnp.bfloat16)

    for b in range(TB):
        # ---- conv1: K shifted MXU matmuls (bf16 in, f32 acc) + bias + ReLU ----
        acc1 = jnp.dot(w1_ref[0], x_ref[b, :, pl.ds(0, L)],
                       preferred_element_type=jnp.float32)
        for i in range(1, K):
            acc1 = acc1 + jnp.dot(w1_ref[i], x_ref[b, :, pl.ds(i * d, L)],
                                  preferred_element_type=jnp.float32)
        h1 = jnp.maximum(acc1 + b1_ref[...], 0.0)
        # dropout1: identity (eval mode)

        # Stage causally re-padded h1 in VMEM scratch (no jnp.concatenate).
        h1_scr[:, pl.ds(pad, L)] = h1.astype(jnp.bfloat16)

        # ---- conv2 over the scratch ref + bias + ReLU ----
        acc2 = jnp.dot(w2_ref[0], h1_scr[:, pl.ds(0, L)],
                       preferred_element_type=jnp.float32)
        for i in range(1, K):
            acc2 = acc2 + jnp.dot(w2_ref[i], h1_scr[:, pl.ds(i * d, L)],
                                  preferred_element_type=jnp.float32)
        h2 = jnp.maximum(acc2 + b2_ref[...], 0.0)
        # dropout2: identity (eval mode)

        # ---- residual path + final ReLU ----
        if has_downsample:
            res = jnp.dot(wd_ref[...], x_ref[b, :, pl.ds(pad, L)],
                          preferred_element_type=jnp.float32) + bd_ref[...]
        else:
            # n_inputs == n_outputs: res = x (passes through the bf16 input copy).
            res = x_ref[b, :, pl.ds(pad, L)].astype(jnp.float32)

        o_ref[b] = jnp.maximum(h2 + res, 0.0)


def temporal_block(x, w1, b1, w2, b2, wd=None, bd=None, *,
                   dilation, padding, stride=1, batch_tile=8):
    """x: (N, C_in, L) f32. Conv weights in PyTorch layout (C_out, C_in, K)."""
    N, c_in, L = x.shape
    c_out, _, K = w1.shape
    assert stride == 1, "TODO(synk): stride != 1 not supported"
    assert padding == (K - 1) * dilation, "causal TCN requires padding=(K-1)*dilation"
    Lp = L + padding

    # Batch elements per grid step (largest divisor of N up to batch_tile).
    TB = min(N, batch_tile)
    while N % TB:
        TB -= 1

    has_downsample = wd is not None

    # Left-pad time axis once in glue; cast matmul operands to bf16 (MXU native).
    x_pad = jnp.pad(x, ((0, 0), (0, 0), (padding, 0))).astype(jnp.bfloat16)
    w1_t = jnp.transpose(w1, (2, 0, 1)).astype(jnp.bfloat16)   # (K, C_out, C_in)
    w2_t = jnp.transpose(w2, (2, 0, 1)).astype(jnp.bfloat16)   # (K, C_out, C_out)
    if has_downsample:
        wd_m = wd[:, :, 0].astype(jnp.bfloat16)                # (C_out, C_in)
        bd_c = bd.reshape(c_out, 1).astype(jnp.float32)
    else:
        wd_m = jnp.zeros((c_out, c_in), jnp.bfloat16)          # unused
        bd_c = jnp.zeros((c_out, 1), jnp.float32)              # unused
    b1_c = b1.reshape(c_out, 1).astype(jnp.float32)
    b2_c = b2.reshape(c_out, 1).astype(jnp.float32)

    kernel = functools.partial(temporal_block_kernel,
                               dilation=dilation,
                               has_downsample=has_downsample)

    return pl.pallas_call(
        kernel,
        out_shape=jax.ShapeDtypeStruct((N, c_out, L), jnp.float32),
        grid_spec=pltpu.PrefetchScalarGridSpec(
            num_scalar_prefetch=0,
            grid=(N // TB,),
            in_specs=[
                pl.BlockSpec((TB, c_in, Lp), lambda n: (n, 0, 0)),
                pl.BlockSpec((K, c_out, c_in), lambda n: (0, 0, 0)),
                pl.BlockSpec((c_out, 1), lambda n: (0, 0)),
                pl.BlockSpec((K, c_out, c_out), lambda n: (0, 0, 0)),
                pl.BlockSpec((c_out, 1), lambda n: (0, 0)),
                pl.BlockSpec((c_out, c_in), lambda n: (0, 0)),
                pl.BlockSpec((c_out, 1), lambda n: (0, 0)),
            ],
            out_specs=pl.BlockSpec((TB, c_out, L), lambda n: (n, 0, 0)),
            scratch_shapes=[pltpu.VMEM((c_out, Lp), jnp.bfloat16)],
        ),
        compiler_params=pltpu.CompilerParams(
            dimension_semantics=("parallel",)),
    )(x_pad, w1_t, b1_c, w2_t, b2_c, wd_m, bd_c)


def _weight_norm(v, g):
    """PyTorch weight_norm (dim=0): w = g * v / ||v||, norm over (C_in, K) per out-channel."""
    norm = jnp.sqrt(jnp.sum(v * v, axis=(1, 2), keepdims=True))
    return g.reshape(-1, 1, 1) * v / norm


def _bf16_round(a):
    return a.astype(jnp.bfloat16).astype(jnp.float32)


def _reference(x, w1, b1, w2, b2, wd, bd, *, dilation, padding):
    """Pure-JAX reference of TemporalBlock.forward (eval mode).

    Matmul operands are rounded to bf16 exactly as in the kernel so the check
    validates the kernel's arithmetic path rather than the bf16 quantization.
    """
    xq = _bf16_round(x)
    w1q, w2q = _bf16_round(w1), _bf16_round(w2)

    def causal_conv(inp, w, b):
        N, c_in, L = inp.shape
        c_out, _, K = w.shape
        xp = jnp.pad(inp, ((0, 0), (0, 0), (padding, 0)))
        out = jnp.zeros((N, c_out, L), jnp.float32)
        for i in range(K):
            out = out + jnp.einsum('oc,ncl->nol', w[:, :, i],
                                   xp[:, :, i * dilation:i * dilation + L])
        return out + b[None, :, None]

    h1 = jax.nn.relu(causal_conv(xq, w1q, b1))
    h2 = jax.nn.relu(causal_conv(_bf16_round(h1), w2q, b2))
    if wd is None:
        res = xq
    else:
        res = jnp.einsum('oc,ncl->nol', _bf16_round(wd[:, :, 0]), xq) \
              + bd[None, :, None]
    return jax.nn.relu(h2 + res)


if __name__ == "__main__":
    # Small shapes consistent with the module: (n, input_channel, seq_len)
    N, C_IN, C_OUT, L = 2, 4, 8, 16
    K, STRIDE, DILATION = 3, 1, 2
    PADDING = (K - 1) * DILATION  # causal padding, chomped on the right

    key = jax.random.PRNGKey(0)
    ks = jax.random.split(key, 8)

    x = jax.random.normal(ks[0], (N, C_IN, L), jnp.float32)

    # weight_norm parameters (v, g) initialized deterministically
    v1 = 0.01 * jax.random.normal(ks[1], (C_OUT, C_IN, K), jnp.float32)
    g1 = 0.5 + jnp.abs(jax.random.normal(ks[2], (C_OUT,), jnp.float32))
    v2 = 0.01 * jax.random.normal(ks[3], (C_OUT, C_OUT, K), jnp.float32)
    g2 = 0.5 + jnp.abs(jax.random.normal(ks[4], (C_OUT,), jnp.float32))
    w1 = _weight_norm(v1, g1)
    w2 = _weight_norm(v2, g2)
    b1 = 0.1 * jax.random.normal(ks[5], (C_OUT,), jnp.float32)
    b2 = 0.1 * jax.random.normal(ks[6], (C_OUT,), jnp.float32)

    # downsample 1x1 conv (n_inputs != n_outputs)
    wd = 0.01 * jax.random.normal(ks[7], (C_OUT, C_IN, 1), jnp.float32)
    bd = jnp.zeros((C_OUT,), jnp.float32)

    out = temporal_block(x, w1, b1, w2, b2, wd, bd,
                         dilation=DILATION, padding=PADDING, stride=STRIDE)
    out = jax.block_until_ready(out)

    ref = _reference(x, w1, b1, w2, b2, wd, bd,
                     dilation=DILATION, padding=PADDING)
    np.testing.assert_allclose(np.asarray(out), np.asarray(ref),
                               rtol=5e-3, atol=5e-3)
    print("KERNEL_OK")
</pallas_src>

<mosaic_0001>
module attributes {stable_mosaic.version = 11 : i64} {
  func.func @temporal_block_kernel(%arg0: i32, %arg1: memref<2x4x20xbf16, #tpu.memory_space<vmem>>, %arg2: memref<3x8x4xbf16, #tpu.memory_space<vmem>>, %arg3: memref<8x1xf32, #tpu.memory_space<vmem>>, %arg4: memref<3x8x8xbf16, #tpu.memory_space<vmem>>, %arg5: memref<8x1xf32, #tpu.memory_space<vmem>>, %arg6: memref<8x4xbf16, #tpu.memory_space<vmem>>, %arg7: memref<8x1xf32, #tpu.memory_space<vmem>>, %arg8: memref<2x8x16xf32, #tpu.memory_space<vmem>>, %arg9: memref<8x20xbf16, #tpu.memory_space<vmem>>) attributes {dimension_semantics = [#tpu.dimension_semantics<parallel>], iteration_bounds = array<i64: 1>, scalar_prefetch = 0 : i64, scratch_operands = 1 : i64, tpu.core_type = #tpu.core_type<tc>, window_params = [{transform_indices = @transform_0, window_bounds = array<i64: 2, 4, 20>}, {pipeline_mode = #tpu.pipeline_mode<synchronous>, transform_indices = @transform_1, window_bounds = array<i64: 3, 8, 4>}, {pipeline_mode = #tpu.pipeline_mode<synchronous>, transform_indices = @transform_2, window_bounds = array<i64: 8, 1>}, {pipeline_mode = #tpu.pipeline_mode<synchronous>, transform_indices = @transform_3, window_bounds = array<i64: 3, 8, 8>}, {pipeline_mode = #tpu.pipeline_mode<synchronous>, transform_indices = @transform_4, window_bounds = array<i64: 8, 1>}, {pipeline_mode = #tpu.pipeline_mode<synchronous>, transform_indices = @transform_5, window_bounds = array<i64: 8, 4>}, {pipeline_mode = #tpu.pipeline_mode<synchronous>, transform_indices = @transform_6, window_bounds = array<i64: 8, 1>}, {transform_indices = @transform_7, window_bounds = array<i64: 2, 8, 16>}]} {
    %cst = arith.constant 0.000000e+00 : bf16
    %0 = vector.broadcast %cst : bf16 to vector<8x4xbf16>
    %c0 = arith.constant 0 : index
    %c0_0 = arith.constant 0 : index
    %1 = vector.load %arg9[%c0, %c0_0] : memref<8x20xbf16, #tpu.memory_space<vmem>>, vector<8x4xbf16>
    tpu.vector_store %arg9[%c0, %c0_0], %0 {strides = array<i32>} : memref<8x20xbf16, #tpu.memory_space<vmem>>, vector<8x4xbf16>,
    %c0_1 = arith.constant 0 : index
    %c0_2 = arith.constant 0 : index
    %c0_3 = arith.constant 0 : index
    %2 = vector.load %arg2[%c0_1, %c0_2, %c0_3] : memref<3x8x4xbf16, #tpu.memory_space<vmem>>, vector<1x8x4xbf16>
    %3 = vector.shape_cast %2 : vector<1x8x4xbf16> to vector<8x4xbf16>
    %c0_4 = arith.constant 0 : index
    %c0_5 = arith.constant 0 : index
    %c0_6 = arith.constant 0 : index
    %4 = vector.load %arg1[%c0_4, %c0_5, %c0_6] : memref<2x4x20xbf16, #tpu.memory_space<vmem>>, vector<1x4x16xbf16>
    %5 = vector.shape_cast %4 : vector<1x4x16xbf16> to vector<4x16xbf16>
    %cst_7 = arith.constant dense<0.000000e+00> : vector<8x16xf32>
    %6 = tpu.matmul %3, %5, %cst_7 {dimension_numbers = #tpu.dot_dimension_numbers<[1], [0], [0], [1], [0, 0, 1, 1], [], []>} : vector<8x4xbf16>, vector<4x16xbf16>, vector<8x16xf32> -> vector<8x16xf32>
    %c1 = arith.constant 1 : index
    %c0_8 = arith.constant 0 : index
    %c0_9 = arith.constant 0 : index
    %7 = vector.load %arg2[%c1, %c0_8, %c0_9] : memref<3x8x4xbf16, #tpu.memory_space<vmem>>, vector<1x8x4xbf16>
    %8 = vector.shape_cast %7 : vector<1x8x4xbf16> to vector<8x4xbf16>
    %c0_10 = arith.constant 0 : index
    %c0_11 = arith.constant 0 : index
    %c2 = arith.constant 2 : index
    %9 = vector.load %arg1[%c0_10, %c0_11, %c2] : memref<2x4x20xbf16, #tpu.memory_space<vmem>>, vector<1x4x16xbf16>
    %10 = vector.shape_cast %9 : vector<1x4x16xbf16> to vector<4x16xbf16>
    %cst_12 = arith.constant dense<0.000000e+00> : vector<8x16xf32>
    %11 = tpu.matmul %8, %10, %cst_12 {dimension_numbers = #tpu.dot_dimension_numbers<[1], [0], [0], [1], [0, 0, 1, 1], [], []>} : vector<8x4xbf16>, vector<4x16xbf16>, vector<8x16xf32> -> vector<8x16xf32>
    %12 = arith.addf %6, %11 : vector<8x16xf32>
    %c2_13 = arith.constant 2 : index
    %c0_14 = arith.constant 0 : index
    %c0_15 = arith.constant 0 : index
    %13 = vector.load %arg2[%c2_13, %c0_14, %c0_15] : memref<3x8x4xbf16, #tpu.memory_space<vmem>>, vector<1x8x4xbf16>
    %14 = vector.shape_cast %13 : vector<1x8x4xbf16> to vector<8x4xbf16>
    %c0_16 = arith.constant 0 : index
    %c0_17 = arith.constant 0 : index
    %c4 = arith.constant 4 : index
    %15 = vector.load %arg1[%c0_16, %c0_17, %c4] : memref<2x4x20xbf16, #tpu.memory_space<vmem>>, vector<1x4x16xbf16>
    %16 = vector.shape_cast %15 : vector<1x4x16xbf16> to vector<4x16xbf16>
    %cst_18 = arith.constant dense<0.000000e+00> : vector<8x16xf32>
    %17 = tpu.matmul %14, %16, %cst_18 {dimension_numbers = #tpu.dot_dimension_numbers<[1], [0], [0], [1], [0, 0, 1, 1], [], []>} : vector<8x4xbf16>, vector<4x16xbf16>, vector<8x16xf32> -> vector<8x16xf32>
    %18 = arith.addf %12, %17 : vector<8x16xf32>
    %c0_19 = arith.constant 0 : index
    %c0_20 = arith.constant 0 : index
    %19 = vector.load %arg3[%c0_19, %c0_20] : memref<8x1xf32, #tpu.memory_space<vmem>>, vector<8x1xf32>
    %20 = vector.broadcast %19 : vector<8x1xf32> to vector<8x16xf32>
    %21 = arith.addf %18, %20 : vector<8x16xf32>
    %cst_21 = arith.constant 0.000000e+00 : f32
    %22 = vector.broadcast %cst_21 : f32 to vector<8x16xf32>
    %23 = arith.maximumf %21, %22 : vector<8x16xf32>
    %24 = arith.truncf %23 : vector<8x16xf32> to vector<8x16xbf16>
    %c0_22 = arith.constant 0 : index
    %c4_23 = arith.constant 4 : index
    %25 = vector.load %arg9[%c0_22, %c4_23] : memref<8x20xbf16, #tpu.memory_space<vmem>>, vector<8x16xbf16>
    tpu.vector_store %arg9[%c0_22, %c4_23], %24 {strides = array<i32>} : memref<8x20xbf16, #tpu.memory_space<vmem>>, vector<8x16xbf16>,
    %c0_24 = arith.constant 0 : index
    %c0_25 = arith.constant 0 : index
    %c0_26 = arith.constant 0 : index
    %26 = vector.load %arg4[%c0_24, %c0_25, %c0_26] : memref<3x8x8xbf16, #tpu.memory_space<vmem>>, vector<1x8x8xbf16>
    %27 = vector.shape_cast %26 : vector<1x8x8xbf16> to vector<8x8xbf16>
    %c0_27 = arith.constant 0 : index
    %c0_28 = arith.constant 0 : index
    %28 = vector.load %arg9[%c0_27, %c0_28] : memref<8x20xbf16, #tpu.memory_space<vmem>>, vector<8x16xbf16>
    %cst_29 = arith.constant dense<0.000000e+00> : vector<8x16xf32>
    %29 = tpu.matmul %27, %28, %cst_29 {dimension_numbers = #tpu.dot_dimension_numbers<[1], [0], [0], [1], [0, 0, 1, 1], [], []>} : vector<8x8xbf16>, vector<8x16xbf16>, vector<8x16xf32> -> vector<8x16xf32>
    %c1_30 = arith.constant 1 : index
    %c0_31 = arith.constant 0 : index
    %c0_32 = arith.constant 0 : index
    %30 = vector.load %arg4[%c1_30, %c0_31, %c0_32] : memref<3x8x8xbf16, #tpu.memory_space<vmem>>, vector<1x8x8xbf16>
    %31 = vector.shape_cast %30 : vector<1x8x8xbf16> to vector<8x8xbf16>
    %c0_33 = arith.constant 0 : index
    %c2_34 = arith.constant 2 : index
    %32 = vector.load %arg9[%c0_33, %c2_34] : memref<8x20xbf16, #tpu.memory_space<vmem>>, vector<8x16xbf16>
    %cst_35 = arith.constant dense<0.000000e+00> : vector<8x16xf32>
    %33 = tpu.matmul %31, %32, %cst_35 {dimension_numbers = #tpu.dot_dimension_numbers<[1], [0], [0], [1], [0, 0, 1, 1], [], []>} : vector<8x8xbf16>, vector<8x16xbf16>, vector<8x16xf32> -> vector<8x16xf32>
    %34 = arith.addf %29, %33 : vector<8x16xf32>
    %c2_36 = arith.constant 2 : index
    %c0_37 = arith.constant 0 : index
    %c0_38 = arith.constant 0 : index
    %35 = vector.load %arg4[%c2_36, %c0_37, %c0_38] : memref<3x8x8xbf16, #tpu.memory_space<vmem>>, vector<1x8x8xbf16>
    %36 = vector.shape_cast %35 : vector<1x8x8xbf16> to vector<8x8xbf16>
    %c0_39 = arith.constant 0 : index
    %c4_40 = arith.constant 4 : index
    %37 = vector.load %arg9[%c0_39, %c4_40] : memref<8x20xbf16, #tpu.memory_space<vmem>>, vector<8x16xbf16>
    %cst_41 = arith.constant dense<0.000000e+00> : vector<8x16xf32>
    %38 = tpu.matmul %36, %37, %cst_41 {dimension_numbers = #tpu.dot_dimension_numbers<[1], [0], [0], [1], [0, 0, 1, 1], [], []>} : vector<8x8xbf16>, vector<8x16xbf16>, vector<8x16xf32> -> vector<8x16xf32>
    %39 = arith.addf %34, %38 : vector<8x16xf32>
    %c0_42 = arith.constant 0 : index
    %c0_43 = arith.constant 0 : index
    %40 = vector.load %arg5[%c0_42, %c0_43] : memref<8x1xf32, #tpu.memory_space<vmem>>, vector<8x1xf32>
    %41 = vector.broadcast %40 : vector<8x1xf32> to vector<8x16xf32>
    %42 = arith.addf %39, %41 : vector<8x16xf32>
    %cst_44 = arith.constant 0.000000e+00 : f32
    %43 = vector.broadcast %cst_44 : f32 to vector<8x16xf32>
    %44 = arith.maximumf %42, %43 : vector<8x16xf32>
    %c0_45 = arith.constant 0 : index
    %c0_46 = arith.constant 0 : index
    %45 = vector.load %arg6[%c0_45, %c0_46] : memref<8x4xbf16, #tpu.memory_space<vmem>>, vector<8x4xbf16>
    %c0_47 = arith.constant 0 : index
    %c0_48 = arith.constant 0 : index
    %c4_49 = arith.constant 4 : index
    %46 = vector.load %arg1[%c0_47, %c0_48, %c4_49] : memref<2x4x20xbf16, #tpu.memory_space<vmem>>, vector<1x4x16xbf16>
    %47 = vector.shape_cast %46 : vector<1x4x16xbf16> to vector<4x16xbf16>
    %cst_50 = arith.constant dense<0.000000e+00> : vector<8x16xf32>
    %48 = tpu.matmul %45, %47, %cst_50 {dimension_numbers = #tpu.dot_dimension_numbers<[1], [0], [0], [1], [0, 0, 1, 1], [], []>} : vector<8x4xbf16>, vector<4x16xbf16>, vector<8x16xf32> -> vector<8x16xf32>
    %c0_51 = arith.constant 0 : index
    %c0_52 = arith.constant 0 : index
    %49 = vector.load %arg7[%c0_51, %c0_52] : memref<8x1xf32, #tpu.memory_space<vmem>>, vector<8x1xf32>
    %50 = vector.broadcast %49 : vector<8x1xf32> to vector<8x16xf32>
    %51 = arith.addf %48, %50 : vector<8x16xf32>
    %52 = arith.addf %44, %51 : vector<8x16xf32>
    %cst_53 = arith.constant 0.000000e+00 : f32
    %53 = vector.broadcast %cst_53 : f32 to vector<8x16xf32>
    %54 = arith.maximumf %52, %53 : vector<8x16xf32>
    %c0_54 = arith.constant 0 : index
    %c0_55 = arith.constant 0 : index
    %c0_56 = arith.constant 0 : index
    %55 = vector.load %arg8[%c0_54, %c0_55, %c0_56] : memref<2x8x16xf32, #tpu.memory_space<vmem>>, vector<1x8x16xf32>
    %56 = vector.shape_cast %55 : vector<1x8x16xf32> to vector<8x16xf32>
    %57 = vector.shape_cast %54 : vector<8x16xf32> to vector<1x8x16xf32>
    tpu.vector_store %arg8[%c0_54, %c0_55, %c0_56], %57 {strides = array<i32>} : memref<2x8x16xf32, #tpu.memory_space<vmem>>, vector<1x8x16xf32>,
    %c0_57 = arith.constant 0 : index
    %c0_58 = arith.constant 0 : index
    %c0_59 = arith.constant 0 : index
    %58 = vector.load %arg2[%c0_57, %c0_58, %c0_59] : memref<3x8x4xbf16, #tpu.memory_space<vmem>>, vector<1x8x4xbf16>
    %59 = vector.shape_cast %58 : vector<1x8x4xbf16> to vector<8x4xbf16>
    %c1_60 = arith.constant 1 : index
    %c0_61 = arith.constant 0 : index
    %c0_62 = arith.constant 0 : index
    %60 = vector.load %arg1[%c1_60, %c0_61, %c0_62] : memref<2x4x20xbf16, #tpu.memory_space<vmem>>, vector<1x4x16xbf16>
    %61 = vector.shape_cast %60 : vector<1x4x16xbf16> to vector<4x16xbf16>
    %cst_63 = arith.constant dense<0.000000e+00> : vector<8x16xf32>
    %62 = tpu.matmul %59, %61, %cst_63 {dimension_numbers = #tpu.dot_dimension_numbers<[1], [0], [0], [1], [0, 0, 1, 1], [], []>} : vector<8x4xbf16>, vector<4x16xbf16>, vector<8x16xf32> -> vector<8x16xf32>
    %c1_64 = arith.constant 1 : index
    %c0_65 = arith.constant 0 : index
    %c0_66 = arith.constant 0 : index
    %63 = vector.load %arg2[%c1_64, %c0_65, %c0_66] : memref<3x8x4xbf16, #tpu.memory_space<vmem>>, vector<1x8x4xbf16>
    %64 = vector.shape_cast %63 : vector<1x8x4xbf16> to vector<8x4xbf16>
    %c1_67 = arith.constant 1 : index
    %c0_68 = arith.constant 0 : index
    %c2_69 = arith.constant 2 : index
    %65 = vector.load %arg1[%c1_67, %c0_68, %c2_69] : memref<2x4x20xbf16, #tpu.memory_space<vmem>>, vector<1x4x16xbf16>
    %66 = vector.shape_cast %65 : vector<1x4x16xbf16> to vector<4x16xbf16>
    %cst_70 = arith.constant dense<0.000000e+00> : vector<8x16xf32>
    %67 = tpu.matmul %64, %66, %cst_70 {dimension_numbers = #tpu.dot_dimension_numbers<[1], [0], [0], [1], [0, 0, 1, 1], [], []>} : vector<8x4xbf16>, vector<4x16xbf16>, vector<8x16xf32> -> vector<8x16xf32>
    %68 = arith.addf %62, %67 : vector<8x16xf32>
    %c2_71 = arith.constant 2 : index
    %c0_72 = arith.constant 0 : index
    %c0_73 = arith.constant 0 : index
    %69 = vector.load %arg2[%c2_71, %c0_72, %c0_73] : memref<3x8x4xbf16, #tpu.memory_space<vmem>>, vector<1x8x4xbf16>
    %70 = vector.shape_cast %69 : vector<1x8x4xbf16> to vector<8x4xbf16>
    %c1_74 = arith.constant 1 : index
    %c0_75 = arith.constant 0 : index
    %c4_76 = arith.constant 4 : index
    %71 = vector.load %arg1[%c1_74, %c0_75, %c4_76] : memref<2x4x20xbf16, #tpu.memory_space<vmem>>, vector<1x4x16xbf16>
    %72 = vector.shape_cast %71 : vector<1x4x16xbf16> to vector<4x16xbf16>
    %cst_77 = arith.constant dense<0.000000e+00> : vector<8x16xf32>
    %73 = tpu.matmul %70, %72, %cst_77 {dimension_numbers = #tpu.dot_dimension_numbers<[1], [0], [0], [1], [0, 0, 1, 1], [], []>} : vector<8x4xbf16>, vector<4x16xbf16>, vector<8x16xf32> -> vector<8x16xf32>
    %74 = arith.addf %68, %73 : vector<8x16xf32>
    %c0_78 = arith.constant 0 : index
    %c0_79 = arith.constant 0 : index
    %75 = vector.load %arg3[%c0_78, %c0_79] : memref<8x1xf32, #tpu.memory_space<vmem>>, vector<8x1xf32>
    %76 = vector.broadcast %75 : vector<8x1xf32> to vector<8x16xf32>
    %77 = arith.addf %74, %76 : vector<8x16xf32>
    %cst_80 = arith.constant 0.000000e+00 : f32
    %78 = vector.broadcast %cst_80 : f32 to vector<8x16xf32>
    %79 = arith.maximumf %77, %78 : vector<8x16xf32>
    %80 = arith.truncf %79 : vector<8x16xf32> to vector<8x16xbf16>
    %c0_81 = arith.constant 0 : index
    %c4_82 = arith.constant 4 : index
    %81 = vector.load %arg9[%c0_81, %c4_82] : memref<8x20xbf16, #tpu.memory_space<vmem>>, vector<8x16xbf16>
    tpu.vector_store %arg9[%c0_81, %c4_82], %80 {strides = array<i32>} : memref<8x20xbf16, #tpu.memory_space<vmem>>, vector<8x16xbf16>,
    %c0_83 = arith.constant 0 : index
    %c0_84 = arith.constant 0 : index
    %c0_85 = arith.constant 0 : index
    %82 = vector.load %arg4[%c0_83, %c0_84, %c0_85] : memref<3x8x8xbf16, #tpu.memory_space<vmem>>, vector<1x8x8xbf16>
    %83 = vector.shape_cast %82 : vector<1x8x8xbf16> to vector<8x8xbf16>
    %c0_86 = arith.constant 0 : index
    %c0_87 = arith.constant 0 : index
    %84 = vector.load %arg9[%c0_86, %c0_87] : memref<8x20xbf16, #tpu.memory_space<vmem>>, vector<8x16xbf16>
    %cst_88 = arith.constant dense<0.000000e+00> : vector<8x16xf32>
    %85 = tpu.matmul %83, %84, %cst_88 {dimension_numbers = #tpu.dot_dimension_numbers<[1], [0], [0], [1], [0, 0, 1, 1], [], []>} : vector<8x8xbf16>, vector<8x16xbf16>, vector<8x16xf32> -> vector<8x16xf32>
    %c1_89 = arith.constant 1 : index
    %c0_90 = arith.constant 0 : index
    %c0_91 = arith.constant 0 : index
    %86 = vector.load %arg4[%c1_89, %c0_90, %c0_91] : memref<3x8x8xbf16, #tpu.memory_space<vmem>>, vector<1x8x8xbf16>
    %87 = vector.shape_cast %86 : vector<1x8x8xbf16> to vector<8x8xbf16>
    %c0_92 = arith.constant 0 : index
    %c2_93 = arith.constant 2 : index
    %88 = vector.load %arg9[%c0_92, %c2_93] : memref<8x20xbf16, #tpu.memory_space<vmem>>, vector<8x16xbf16>
    %cst_94 = arith.constant dense<0.000000e+00> : vector<8x16xf32>
    %89 = tpu.matmul %87, %88, %cst_94 {dimension_numbers = #tpu.dot_dimension_numbers<[1], [0], [0], [1], [0, 0, 1, 1], [], []>} : vector<8x8xbf16>, vector<8x16xbf16>, vector<8x16xf32> -> vector<8x16xf32>
    %90 = arith.addf %85, %89 : vector<8x16xf32>
    %c2_95 = arith.constant 2 : index
    %c0_96 = arith.constant 0 : index
    %c0_97 = arith.constant 0 : index
    %91 = vector.load %arg4[%c2_95, %c0_96, %c0_97] : memref<3x8x8xbf16, #tpu.memory_space<vmem>>, vector<1x8x8xbf16>
    %92 = vector.shape_cast %91 : vector<1x8x8xbf16> to vector<8x8xbf16>
    %c0_98 = arith.constant 0 : index
    %c4_99 = arith.constant 4 : index
    %93 = vector.load %arg9[%c0_98, %c4_99] : memref<8x20xbf16, #tpu.memory_space<vmem>>, vector<8x16xbf16>
    %cst_100 = arith.constant dense<0.000000e+00> : vector<8x16xf32>
    %94 = tpu.matmul %92, %93, %cst_100 {dimension_numbers = #tpu.dot_dimension_numbers<[1], [0], [0], [1], [0, 0, 1, 1], [], []>} : vector<8x8xbf16>, vector<8x16xbf16>, vector<8x16xf32> -> vector<8x16xf32>
    %95 = arith.addf %90, %94 : vector<8x16xf32>
    %c0_101 = arith.constant 0 : index
    %c0_102 = arith.constant 0 : index
    %96 = vector.load %arg5[%c0_101, %c0_102] : memref<8x1xf32, #tpu.memory_space<vmem>>, vector<8x1xf32>
    %97 = vector.broadcast %96 : vector<8x1xf32> to vector<8x16xf32>
    %98 = arith.addf %95, %97 : vector<8x16xf32>
    %cst_103 = arith.constant 0.000000e+00 : f32
    %99 = vector.broadcast %cst_103 : f32 to vector<8x16xf32>
    %100 = arith.maximumf %98, %99 : vector<8x16xf32>
    %c0_104 = arith.constant 0 : index
    %c0_105 = arith.constant 0 : index
    %101 = vector.load %arg6[%c0_104, %c0_105] : memref<8x4xbf16, #tpu.memory_space<vmem>>, vector<8x4xbf16>
    %c1_106 = arith.constant 1 : index
    %c0_107 = arith.constant 0 : index
    %c4_108 = arith.constant 4 : index
    %102 = vector.load %arg1[%c1_106, %c0_107, %c4_108] : memref<2x4x20xbf16, #tpu.memory_space<vmem>>, vector<1x4x16xbf16>
    %103 = vector.shape_cast %102 : vector<1x4x16xbf16> to vector<4x16xbf16>
    %cst_109 = arith.constant dense<0.000000e+00> : vector<8x16xf32>
    %104 = tpu.matmul %101, %103, %cst_109 {dimension_numbers = #tpu.dot_dimension_numbers<[1], [0], [0], [1], [0, 0, 1, 1], [], []>} : vector<8x4xbf16>, vector<4x16xbf16>, vector<8x16xf32> -> vector<8x16xf32>
    %c0_110 = arith.constant 0 : index
    %c0_111 = arith.constant 0 : index
    %105 = vector.load %arg7[%c0_110, %c0_111] : memref<8x1xf32, #tpu.memory_space<vmem>>, vector<8x1xf32>
    %106 = vector.broadcast %105 : vector<8x1xf32> to vector<8x16xf32>
    %107 = arith.addf %104, %106 : vector<8x16xf32>
    %108 = arith.addf %100, %107 : vector<8x16xf32>
    %cst_112 = arith.constant 0.000000e+00 : f32
    %109 = vector.broadcast %cst_112 : f32 to vector<8x16xf32>
    %110 = arith.maximumf %108, %109 : vector<8x16xf32>
    %c1_113 = arith.constant 1 : index
    %c0_114 = arith.constant 0 : index
    %c0_115 = arith.constant 0 : index
    %111 = vector.load %arg8[%c1_113, %c0_114, %c0_115] : memref<2x8x16xf32, #tpu.memory_space<vmem>>, vector<1x8x16xf32>
    %112 = vector.shape_cast %111 : vector<1x8x16xf32> to vector<8x16xf32>
    %113 = vector.shape_cast %110 : vector<8x16xf32> to vector<1x8x16xf32>
    tpu.vector_store %arg8[%c1_113, %c0_114, %c0_115], %113 {strides = array<i32>} : memref<2x8x16xf32, #tpu.memory_space<vmem>>, vector<1x8x16xf32>,
    return
  }
  func.func @transform_0(%arg0: i32) -> (i32, i32, i32) {
    %c0_i32 = arith.constant 0 : i32
    %c0_i32_0 = arith.constant 0 : i32
    %c0_i32_1 = arith.constant 0 : i32
    return %arg0, %c0_i32, %c0_i32_0 : i32, i32, i32
  }
  func.func @transform_1(%arg0: i32) -> (i32, i32, i32) {
    %c0_i32 = arith.constant 0 : i32
    %c0_i32_0 = arith.constant 0 : i32
    %c0_i32_1 = arith.constant 0 : i32
    %c0_i32_2 = arith.constant 0 : i32
    return %c0_i32, %c0_i32_0, %c0_i32_1 : i32, i32, i32
  }
  func.func @transform_2(%arg0: i32) -> (i32, i32) {
    %c0_i32 = arith.constant 0 : i32
    %c0_i32_0 = arith.constant 0 : i32
    %c0_i32_1 = arith.constant 0 : i32
    return %c0_i32, %c0_i32_0 : i32, i32
  }
  func.func @transform_3(%arg0: i32) -> (i32, i32, i32) {
    %c0_i32 = arith.constant 0 : i32
    %c0_i32_0 = arith.constant 0 : i32
    %c0_i32_1 = arith.constant 0 : i32
    %c0_i32_2 = arith.constant 0 : i32
    return %c0_i32, %c0_i32_0, %c0_i32_1 : i32, i32, i32
  }
  func.func @transform_4(%arg0: i32) -> (i32, i32) {
    %c0_i32 = arith.constant 0 : i32
    %c0_i32_0 = arith.constant 0 : i32
    %c0_i32_1 = arith.constant 0 : i32
    return %c0_i32, %c0_i32_0 : i32, i32
  }
  func.func @transform_5(%arg0: i32) -> (i32, i32) {
    %c0_i32 = arith.constant 0 : i32
    %c0_i32_0 = arith.constant 0 : i32
    %c0_i32_1 = arith.constant 0 : i32
    return %c0_i32, %c0_i32_0 : i32, i32
  }
  func.func @transform_6(%arg0: i32) -> (i32, i32) {
    %c0_i32 = arith.constant 0 : i32
    %c0_i32_0 = arith.constant 0 : i32
    %c0_i32_1 = arith.constant 0 : i32
    return %c0_i32, %c0_i32_0 : i32, i32
  }
  func.func @transform_7(%arg0: i32) -> (i32, i32, i32) {
    %c0_i32 = arith.constant 0 : i32
    %c0_i32_0 = arith.constant 0 : i32
    %c0_i32_1 = arith.constant 0 : i32
    return %arg0, %c0_i32, %c0_i32_0 : i32, i32, i32
  }
}

</mosaic_0001>

<bundles_post_ra>
// kernel: tpu_custom_call.1
= control target key start
LH: loop header
LB: loop body
LE: loop exit
PB: predicated region body
PF: predicated region fallthrough
CT: control target
= control target key end

     0   :  { %s694_s0 = inlined_call_operand.vmem [shape: bf16[2,4,20], index: 0, kind: input, shape index: {}]   ;;  %s695_s1 = inlined_call_operand.vmem [shape: bf16[3,8,4], index: 1, kind: input, shape index: {}]   ;;  %s696_s2 = inlined_call_operand.vmem [shape: f32[8,1], index: 2, kind: input, shape index: {}]   ;;  %s697_s3 = inlined_call_operand.vmem [shape: bf16[3,8,8], index: 3, kind: input, shape index: {}]   ;;  %s698_s4 = inlined_call_operand.vmem [shape: f32[8,1], index: 4, kind: input, shape index: {}]   ;;  %s699_s5 = inlined_call_operand.vmem [shape: bf16[8,4], index: 5, kind: input, shape index: {}]   ;;  %s700_s6 = inlined_call_operand.vmem [shape: f32[8,1], index: 6, kind: input, shape index: {}]   ;;  %s701_s7 = inlined_call_operand.hbm [shape: f32[2,8,16], index: 7, kind: output, shape index: {}]  }
   0x1   :  { %v31_v0 = vld [vmem:[%s694_s0] sm:$0x3] }
   0x2   :  { %35 = vst [vmem:[#allocation1] ss:$4 sm:$0xff] %v31_v0 }
   0x3   :  { %12 = vsyncpa [#allocation4], 0  ;;  %v81_v1 = vld [vmem:[%s694_s0] sm:$0x3]  ;;  %s523_s30 = smov 124   ;;  %s524_s10 = smov 126  }
   0x4   :  { %v205_v3 = vld [vmem:[%s694_s0] sm:$0x3]  ;;  %v583_v5 = vld [vmem:[%s694_s0 + $0x2] sm:$0x3]  ;;  %vm44_vm0 = vcmask 1041408   ;;  %vm40_vm1 = vcmask 31744  }
   0x5   :  { %v478_v7 = vld [vmem:[%s694_s0 + $0x2] sm:$0x3]  ;;  %v64_v9 = vsel %vm44_vm0, %v31_v0, 0  ;;  %v525_v12 = vmov 0   ;;  %v465_v15 = vld [vmem:[%s695_s1 + $0x8] sm:$0xf] }
   0x6   :  { %73 = vmatpush.bf16.msra.mxu1 %v64_v9  ;;  %v30_v10 = vld [vmem:[%s695_s1] sm:$0xf]  ;;  %494 = vset.pattern.permute.xlu1 %v525_v12  ;;  %v462_v18 = vld [vmem:[%s695_s1 + $0x4] sm:$0xf]  ;;  %s526_s22 = smov 4   ;;  %vm28_vm2 = vcmask 27648  }
   0x7   :  { %v108_v11 = vld [vmem:[%s696_s2] sm:$0xff]  ;;  %495 = vset.pattern.permute.xlu2 %v525_v12  ;;  %496 = vset.pattern.permute.xlu0 %v525_v12  ;;  %29 = vst.msk [vmem:[#allocation2] sm:$0xf] %vm28_vm2, %v525_v12  ;;  %vm121_vm3 = vcmask 158752   ;;  %vm136_vm4 = vcmask 1043456   ;;  %vm132_vm5 = vcmask 64512  }
   0x8   :  { %111 = vperm.xlu1 %494, %v108_v11   ;;  %v485_v22 = vld [vmem:[%s694_s0 + $0x2] sm:$0x3]  ;;  %v273_v45 = vsel %vm44_vm0, %v583_v5, 0  ;;  %v467_v51 = vld [vmem:[%s697_s3 + $0x4] sm:$0xf]  ;;  %vm239_vm6 = vcmask 130048  }
   0x9   :  { %v36_v2 = vld.sshfl [vmem:[#allocation1] sm:$0xff pattern:$0x73625140]  ;;  %464 = vmatmul.msk.bf16.vlgmr.msra.gmra.mxu1 %vm40_vm1, %v30_v10  ;;  %v470_v56 = vld [vmem:[%s697_s3 + $0x8] sm:$0xf]  ;;  %s527_s20 = smov [#allocation3]  }
   0xa   :  { %83 = vst [vmem:[#allocation1] ss:$4 sm:$0xff] %v81_v1  ;;  %v619_v34 = vld [vmem:[%s700_s6] sm:$0xff]  ;;  %v477_v59 = vld [vmem:[%s695_s1 + $0x8] sm:$0xf]  ;;  %s448_s21 = sshll.u32 %s527_s20, 4  ;;  %s449_s21 = int_to_ptr.vmem [resolvable:$true] %s448_s21 }
   0xb   :  { %v204_v43 = vld [vmem:[%s699_s5] sm:$0xf]  ;;  %v474_v58 = vld [vmem:[%s695_s1 + $0x4] sm:$0xf]  ;;  %s528_s23 = smov 128   ;;  %s529_s6 = smov 8  }
   0xc   :  { %v123_v44 = vld [vmem:[%s697_s3] sm:$0xf] }
   0xd   :  { %v241_v46 = vld [vmem:[%s695_s1] sm:$0xf] }
  0x11   :  { %v84_v4 = vld.sshfl [vmem:[#allocation1] sm:$0xff pattern:$0x73625140] }
  0x12   :  { %86 = vrot.lane.b32.xlu0 %v84_v4, %s523_s30  ;;  %213 = vst [vmem:[#allocation1] ss:$4 sm:$0xff] %v205_v3 }
  0x19   :  { %v214_v6 = vld.sshfl [vmem:[#allocation1] sm:$0xff pattern:$0x73625140] }
  0x1a   :  { %246 = vst [vmem:[#allocation1] ss:$4 sm:$0xff] %v583_v5  ;;  %38 = vrot.lane.b32.xlu0 %v36_v2, %s524_s10  ;;  %v407_v2 = vld [vmem:[%s699_s5] sm:$0xf] }
  0x21   :  { %v247_v8 = vld.sshfl [vmem:[#allocation1] sm:$0xff pattern:$0x73625140] }
  0x22   :  { %291 = vst [vmem:[#allocation1] ss:$4 sm:$0xff] %v478_v7  ;;  %249 = vrot.lane.b32.xlu0 %v247_v8, %s524_s10 }
  0x29   :  { %v292_v21 = vld.sshfl [vmem:[#allocation1] sm:$0xff pattern:$0x73625140] }
  0x2a   :  { %416 = vst [vmem:[#allocation1] ss:$4 sm:$0xff] %v485_v22 }
  0x31   :  { %v417_v33 = vld.sshfl [vmem:[#allocation1] sm:$0xff pattern:$0x73625140] }
  0x7a   :  { %v112_v26 = vpop.permute.xlu1 %111 }
  0x84   :  { %v87_v13 = vpop.permute.xlu0 %86 }
  0x85   :  { %v92_v14 = vsel %vm44_vm0, %v87_v13, 0 }
  0x86   :  { %101 = vmatpush.bf16.msra.mxu2 %v92_v14  ;;  %v75_v19 = vpop.f32.mrf.mxu1 }
  0x89   :  { %466 = vmatmul.msk.bf16.vlgmr.msra.gmra.mxu2 %vm40_vm1, %v465_v15 }
  0x8c   :  { %v39_v16 = vpop.permute.xlu0 %38 }
  0x8d   :  { %v46_v17 = vsel %vm44_vm0, %v39_v16, 0 }
  0x8e   :  { %55 = vmatpush.bf16.msra.mxu0 %v46_v17  ;;  %v77_v20 = vpop.f32.mrf.mxu1 }
  0x91   :  { %463 = vmatmul.msk.bf16.vlgmr.msra.gmra.mxu0 %vm40_vm1, %v462_v18 }
  0x94   :  { %v250_v47 = vpop.permute.xlu0 %249 }
  0x95   :  { %v255_v49 = vsel %vm44_vm0, %v250_v47, 0 }
 0x10c   :  { %v103_v23 = vpop.f32.mrf.mxu2 }
 0x10e   :  { %v57_v24 = vpop.f32.mrf.mxu0 }
 0x10f   :  { %v76_v25 = vadd.f32 %v75_v19, %v57_v24  ;;  %v196_v24 = vld [vmem:[%s698_s4] sm:$0xff] }
 0x111   :  { %v107_v27 = vadd.f32 %v103_v23, %v76_v25  ;;  %v330_v25 = vld [vmem:[%s697_s3] sm:$0xf] }
 0x113   :  { %v114_v28 = vadd.f32 %v112_v26, %v107_v27 }
 0x114   :  { %v105_v29 = vpop.f32.mrf.mxu2 }
 0x115   :  { %v115_v30 = vmax.f32 %v114_v28, 0.0 }
 0x116   :  { %v59_v31 = vpop.f32.mrf.mxu0 }
 0x117   :  { %v116_v32 = vpack.c.bf16 %v115_v30, %v115_v30  ;;  %v480_v30 = vld [vmem:[%s697_s3 + $0x4] sm:$0xf] }
 0x119   :  { %118 = vrot.lane.b32.xlu1 %v116_v32, %s526_s22 }
 0x121   :  { %294 = vrot.lane.b32.xlu1 %v292_v21, %s523_s30 }
 0x129   :  { %216 = vrot.lane.b32.xlu1 %v214_v6, %s523_s30 }
 0x131   :  { %419 = vrot.lane.b32.xlu1 %v417_v33, %s523_s30 }
 0x139   :  { %209 = vperm.xlu1 %494, %v619_v34  }
 0x18b   :  { %v119_v35 = vpop.permute.xlu1 %118 }
 0x18c   :  { %122 = vst.msk [vmem:[#allocation2] sm:$0xf] %vm121_vm3, %v119_v35 }
 0x193   :  { %v295_v36 = vpop.permute.xlu1 %294  ;;  %v124_v37 = vld [vmem:[#allocation2] sm:$0xf] }
 0x194   :  { %v157_v38 = vsel %vm136_vm4, %v124_v37, 0  ;;  %v128_v39 = vunpack.c.l.b16 %v124_v37  ;;  %v300_v52 = vsel %vm44_vm0, %v295_v36, 0 }
 0x195   :  { %166 = vmatpush.bf16.msrb.mxu0 %v157_v38 }
 0x196   :  { %v129_v40 = vpack.c.b16 %v128_v39, %v128_v39 }
 0x198   :  { %130 = vrot.lane.b32.xlu2 %v129_v40, %s524_s10  ;;  %469 = vmatmul.msk.bf16.vlgmr.msrb.gmra.mxu0 %vm132_vm5, %v123_v44 }
 0x199   :  { %282 = vmatpush.bf16.msra.mxu0 %v273_v45 }
 0x19b   :  { %v217_v41 = vpop.permute.xlu1 %216 }
 0x19c   :  { %v222_v42 = vsel %vm44_vm0, %v217_v41, 0 }
 0x19d   :  { %231 = vmatpush.bf16.msrb.mxu2 %v222_v42 }
 0x1a0   :  { %472 = vmatmul.msk.bf16.vlgmr.msrb.gmra.mxu2 %vm40_vm1, %v204_v43  ;;  %174 = vrot.lane.b32.xlu2 %v129_v40, %s523_s30  ;;  %v483_v40 = vld [vmem:[%s697_s3 + $0x8] sm:$0xf]  ;;  %s450_s3 = sshll.u32 %s701_s7, 4  ;;  %s451_s3 = int_to_ptr.hbm [resolvable:$true] %s450_s3 }
 0x1a3   :  { %v420_v55 = vpop.permute.xlu1 %419 }
 0x1a4   :  { %v425_v57 = vsel %vm44_vm0, %v420_v55, 0 }
 0x1a8   :  { %319 = vperm.xlu2 %495, %v108_v11   ;;  %476 = vmatmul.msk.bf16.vlgmr.msra.gmra.mxu0 %vm40_vm1, %v241_v46 }
 0x1ab   :  { %v210_v33 = vpop.permute.xlu1 %209 }
 0x1f2   :  { %v131_v48 = vpop.permute.xlu2 %130 }
 0x1f3   :  { %v138_v50 = vsel %vm136_vm4, %v131_v48, 0 }
 0x1f4   :  { %147 = vmatpush.bf16.msra.mxu3 %v138_v50 }
 0x1f7   :  { %468 = vmatmul.msk.bf16.vlgmr.msra.gmra.mxu3 %vm132_vm5, %v467_v51 }
 0x1f8   :  { %264 = vmatpush.bf16.msrb.mxu3 %v255_v49 }
 0x1fa   :  { %v175_v53 = vpop.permute.xlu2 %174 }
 0x1fb   :  { %v180_v54 = vsel %vm136_vm4, %v175_v53, 0 }
 0x1fc   :  { %189 = vmatpush.bf16.msrb.mxu1 %v180_v54 }
 0x1ff   :  { %471 = vmatmul.msk.bf16.vlgmr.msrb.gmra.mxu1 %vm132_vm5, %v470_v56 }
 0x200   :  { %309 = vmatpush.bf16.msra.mxu1 %v300_v52 }
 0x202   :  { %v320_v12 = vpop.permute.xlu2 %319 }
 0x204   :  { %434 = vmatpush.bf16.msrb.mxu1 %v425_v57 }
 0x207   :  { %475 = vmatmul.msk.bf16.vlgmr.msrb.gmra.mxu3 %vm40_vm1, %v474_v58 }
 0x20f   :  { %479 = vmatmul.msk.bf16.vlgmr.msra.gmra.mxu1 %vm40_vm1, %v477_v59 }
 0x215   :  { %v168_v62 = vpop.f32.mrf.mxu0 }
 0x21d   :  { %v170_v63 = vpop.f32.mrf.mxu0 }
 0x21f   :  { %486 = vmatmul.msk.bf16.vlgmr.msrb.gmra.mxu1 %vm40_vm1, %v407_v2 }
 0x223   :  { %v233_v60 = vpop.f32.mrf.mxu2 }
 0x225   :  { %v284_v0 = vpop.f32.mrf.mxu0 }
 0x22b   :  { %v235_v61 = vpop.f32.mrf.mxu2 }
 0x22d   :  { %v286_v1 = vpop.f32.mrf.mxu0 }
 0x27a   :  { %v149_v3 = vpop.f32.mrf.mxu3 }
 0x27b   :  { %v169_v4 = vadd.f32 %v168_v62, %v149_v3 }
 0x27c   :  { %v191_v5 = vpop.f32.mrf.mxu1 }
 0x27d   :  { %v195_v6 = vadd.f32 %v191_v5, %v169_v4 }
 0x282   :  { %v151_v7 = vpop.f32.mrf.mxu3 }
 0x284   :  { %v193_v8 = vpop.f32.mrf.mxu1 }
 0x28a   :  { %v266_v9 = vpop.f32.mrf.mxu3 }
 0x28b   :  { %v285_v10 = vadd.f32 %v284_v0, %v266_v9 }
 0x28c   :  { %v311_v11 = vpop.f32.mrf.mxu1 }
 0x28d   :  { %v315_v13 = vadd.f32 %v311_v11, %v285_v10 }
 0x28f   :  { %v322_v14 = vadd.f32 %v320_v12, %v315_v13 }
 0x291   :  { %v323_v15 = vmax.f32 %v322_v14, 0.0 }
 0x292   :  { %v268_v16 = vpop.f32.mrf.mxu3 }
 0x293   :  { %v324_v17 = vpack.c.bf16 %v323_v15, %v323_v15 }
 0x294   :  { %v313_v18 = vpop.f32.mrf.mxu1 }
 0x295   :  { %326 = vrot.lane.b32.xlu0 %v324_v17, %s526_s22 }
 0x29c   :  { %v436_v26 = vpop.f32.mrf.mxu1 }
 0x2a4   :  { %v438_v27 = vpop.f32.mrf.mxu1 }
 0x307   :  { %v327_v19 = vpop.permute.xlu0 %326 }
 0x308   :  { %329 = vst.msk [vmem:[#allocation2] sm:$0xf] %vm121_vm3, %v327_v19 }
 0x30f   :  { %v331_v20 = vld [vmem:[#allocation2] sm:$0xf] }
 0x310   :  { %v361_v21 = vsel %vm136_vm4, %v331_v20, 0  ;;  %v334_v22 = vunpack.c.l.b16 %v331_v20 }
 0x311   :  { %370 = vmatpush.bf16.msra.mxu3 %v361_v21 }
 0x312   :  { %v335_v23 = vpack.c.b16 %v334_v22, %v334_v22 }
 0x314   :  { %377 = vrot.lane.b32.xlu0 %v335_v23, %s523_s30  ;;  %336 = vrot.lane.b32.xlu2 %v335_v23, %s524_s10 }
 0x315   :  { %482 = vmatmul.msk.bf16.vlgmr.msra.gmra.mxu3 %vm132_vm5, %v330_v25 }
 0x31c   :  { %199 = vperm.xlu2 %495, %v196_v24   ;;  %402 = vperm.xlu0 %496, %v196_v24  }
 0x324   :  { %412 = vperm.xlu2 %495, %v619_v34   ;;  %v234_v34 = vadd.f32 %v233_v60, %v210_v33 }
 0x36e   :  { %v337_v28 = vpop.permute.xlu2 %336 }
 0x36f   :  { %v342_v29 = vsel %vm136_vm4, %v337_v28, 0 }
 0x370   :  { %351 = vmatpush.bf16.msra.mxu2 %v342_v29 }
 0x373   :  { %481 = vmatmul.msk.bf16.vlgmr.msra.gmra.mxu2 %vm132_vm5, %v480_v30 }
 0x376   :  { %v200_v31 = vpop.permute.xlu2 %199 }
 0x377   :  { %v202_v32 = vadd.f32 %v200_v31, %v195_v6 }
 0x379   :  { %v203_v35 = vmax.f32 %v202_v32, 0.0 }
 0x37b   :  { %v237_v36 = vadd.f32 %v234_v34, %v203_v35 }
 0x37d   :  { %v238_v37 = vmax.f32 %v237_v36, 0.0 }
 0x37e   :  { %v413_v49 = vpop.permute.xlu2 %412 }
 0x37f   :  { %240 = vst.msk [vmem:[#allocation3] sm:$0xff] %vm239_vm6, %v238_v37  ;;  %v437_v51 = vadd.f32 %v436_v26, %v413_v49 }
 0x386   :  { %v378_v38 = vpop.permute.xlu0 %377 }
 0x387   :  { %v383_v39 = vsel %vm136_vm4, %v378_v38, 0 }
 0x388   :  { %392 = vmatpush.bf16.msrb.mxu0 %v383_v39 }
 0x38b   :  { %484 = vmatmul.msk.bf16.vlgmr.msrb.gmra.mxu0 %vm132_vm5, %v483_v40 }
 0x38e   :  { %v403_v47 = vpop.permute.xlu0 %402 }
 0x398   :  { %v372_v41 = vpop.f32.mrf.mxu3 }
 0x3a0   :  { %v374_v42 = vpop.f32.mrf.mxu3 }
 0x3f6   :  { %v353_v43 = vpop.f32.mrf.mxu2 }
 0x3f7   :  { %v373_v45 = vadd.f32 %v372_v41, %v353_v43 }
 0x3fe   :  { %v355_v44 = vpop.f32.mrf.mxu2 }
 0x408   :  { %v394_v46 = vpop.f32.mrf.mxu0 }
 0x409   :  { %v398_v48 = vadd.f32 %v394_v46, %v373_v45 }
 0x40b   :  { %v405_v50 = vadd.f32 %v403_v47, %v398_v48 }
 0x40d   :  { %v406_v52 = vmax.f32 %v405_v50, 0.0 }
 0x40f   :  { %v440_v53 = vadd.f32 %v437_v51, %v406_v52 }
 0x410   :  { %v396_v54 = vpop.f32.mrf.mxu0 }
 0x411   :  { %v441_v55 = vmax.f32 %v440_v53, 0.0 }
 0x413   :  { %443 = vst.msk [vmem:[#allocation3 + $0x8] sm:$0xff] %vm239_vm6, %v441_v55 }
 0x414   :  { %456 = dma.vmem_to_hbm [thread:$0]  %s449_s21, 256, %s451_s3, [#allocation4], %s528_s23, %s528_s23, %s529_s6  }
 0x415   :  { %521 = dma.done.wait [#allocation4], 256  }
 0x416   :  { %522 = vsyncadd [#allocation4], 4294967040 }
 0x417   :  { %461 = vsyncpa [#allocation4], 1 }

</bundles_post_ra>
